<compile_context>
chip_gen: v7x
topology: tpu7x:2x2x1
jax: 0.10.0
libtpu: 0.0.40
codegen_flags: <defaults>
</compile_context>

<pallas_src>
import functools
import math

import jax
import jax.numpy as jnp
from jax import lax
from jax.experimental import pallas as pl
from jax.experimental.pallas import tpu as pltpu

_MASK_VALUE = -1e30  # large finite negative (avoids -inf -> NaN with padding masks)


def _vmem_limit_bytes():
    """Generation-aware scoped-VMEM budget (~75% of physical, capped)."""
    cap = 64 * 1024 * 1024
    try:
        info = pltpu.get_tpu_info()
        cap = int(getattr(info, "vmem_capacity_bytes", cap))
    except Exception:
        pass
    return max(16 * 1024 * 1024, min(int(cap * 3 // 4), 112 * 1024 * 1024))


# ---------------------------------------------------------------------------
# Pass 1: fused full-width Q/K/V projections, emitted head-major + pre-scaled Q.
# ---------------------------------------------------------------------------
def _qkv_proj_kernel(x_ref, wq_ref, wk_ref, wv_ref, q_ref, k_ref, v_ref,
                     *, num_heads, scale):
    """grid = (batch, seq_tile).

    x_ref : (1, tt, d_in)   bf16
    w*_ref: (d_in, d_out)   bf16 (constant index_map -> fetched once, lane-dense)
    q/k/v : (1, H, tt, hd)  bf16 head-major outputs; Q pre-scaled by 1/sqrt(hd)
    """
    x = x_ref[0]                                   # (tt, d_in) bf16
    tt = x.shape[0]
    hd = q_ref.shape[-1]

    def proj(w_ref):
        return jnp.dot(x, w_ref[...], preferred_element_type=jnp.float32)

    def to_heads(y):                               # (tt, d_out) -> (H, tt, hd)
        return jnp.transpose(y.reshape(tt, num_heads, hd), (1, 0, 2))

    q_ref[0] = to_heads(proj(wq_ref) * scale).astype(q_ref.dtype)
    k_ref[0] = to_heads(proj(wk_ref)).astype(k_ref.dtype)
    v_ref[0] = to_heads(proj(wv_ref)).astype(v_ref.dtype)


# ---------------------------------------------------------------------------
# Pass 2: flash-style causal attention (all heads at once) + output projection.
# ---------------------------------------------------------------------------
def _flash_attn_kernel(q_ref, k_ref, v_ref, wo_ref, bo_ref, o_ref,
                       m_scr, l_scr, acc_scr):
    """grid = (batch, q_tile, kv_tile); kv_tile is the innermost 'arbitrary' axis.

    q_ref  : (1, H, tq, hd) bf16 (pre-scaled)
    k_ref  : (1, H, tk, hd) bf16
    v_ref  : (1, H, tk, hd) bf16
    wo_ref : (d_out, d_out) bf16
    bo_ref : (1, d_out)     f32
    o_ref  : (1, tq, d_out) (resident across the kv axis)
    m_scr  : (H, tq, 1)  f32   running row max     (same layout as scores)
    l_scr  : (H, tq, 1)  f32   running denominator
    acc_scr: (H, tq, hd) f32   running (P @ V) accumulator
    """
    qi = pl.program_id(1)
    ki = pl.program_id(2)
    nkv = pl.num_programs(2)

    H, tq, hd = q_ref.shape[1], q_ref.shape[2], q_ref.shape[3]
    tk = k_ref.shape[2]

    q_start = qi * tq
    k_start = ki * tk
    q_end = q_start + (tq - 1)
    k_end = k_start + (tk - 1)

    @pl.when(ki == 0)
    def _init():
        # -inf init is safe: each query row sees at least key 0 in the first
        # KV tile, so m becomes finite immediately.
        m_scr[...] = jnp.full_like(m_scr, -jnp.inf)
        l_scr[...] = jnp.zeros_like(l_scr)
        acc_scr[...] = jnp.zeros_like(acc_scr)

    def _step(apply_mask):
        q = q_ref[0]                              # (H, tq, hd) bf16 pre-scaled
        k = k_ref[0]                              # (H, tk, hd) bf16
        v = v_ref[0]                              # (H, tk, hd) bf16

        # Scores for all heads at once: bf16 MXU, f32 accumulation.
        s = jnp.einsum("hqd,hkd->hqk", q, k,
                       preferred_element_type=jnp.float32)     # (H, tq, tk)

        if apply_mask:
            # Single 2-D mask broadcast across heads (only on straddle tiles).
            rows = q_start + lax.broadcasted_iota(jnp.int32, (tq, tk), 0)
            cols = k_start + lax.broadcasted_iota(jnp.int32, (tq, tk), 1)
            s = jnp.where((cols > rows)[None, :, :], _MASK_VALUE, s)

        # Online softmax update; m/l kept in the same (H, tq, 1) layout as s.
        m_prev = m_scr[...]
        m_new = jnp.maximum(m_prev, jnp.max(s, axis=-1, keepdims=True))
        alpha = jnp.exp(m_prev - m_new)                         # (H, tq, 1)
        p = jnp.exp(s - m_new)                                  # (H, tq, tk)
        l_scr[...] = alpha * l_scr[...] + jnp.sum(p, axis=-1, keepdims=True)
        pv = jnp.einsum("hqk,hkd->hqd", p.astype(v.dtype), v,
                        preferred_element_type=jnp.float32)     # (H, tq, hd)
        acc_scr[...] = alpha * acc_scr[...] + pv
        m_scr[...] = m_new

    # Diagonal-straddling tile: apply the causal mask.
    @pl.when(jnp.logical_and(k_start <= q_end, k_end > q_start))
    def _masked():
        _step(True)

    # Fully-visible tile (strictly below the diagonal): no mask / select needed.
    @pl.when(k_end <= q_start)
    def _unmasked():
        _step(False)

    # Fully-masked tiles (k_start > q_end) do nothing; their K/V DMA is also
    # elided by the clamped index_map in the wrapper.

    @pl.when(ki == nkv - 1)
    def _flush():
        inv_l = pl.reciprocal(l_scr[...], approx=True)          # EUP, ~free
        ctx = acc_scr[...] * inv_l                              # (H, tq, hd) f32
        ctx = jnp.transpose(ctx, (1, 0, 2)).reshape(tq, H * hd)  # (tq, d_out)
        out = jnp.dot(ctx.astype(jnp.bfloat16), wo_ref[...],
                      preferred_element_type=jnp.float32)
        out = out + bo_ref[...]
        o_ref[0] = out.astype(o_ref.dtype)


# ---------------------------------------------------------------------------
# Tile / VMEM selection helpers.
# ---------------------------------------------------------------------------
def _pick_seq_tile(t, preferred=None):
    """Choose a sequence tile: multiple of 8 that divides t, else full extent."""
    if preferred is not None and t % preferred == 0 and (preferred % 8 == 0 or preferred == t):
        return preferred
    for cand in (256, 128, 64, 32, 16, 8):
        if t % cand == 0:
            return cand
    return t


def _pass2_vmem_estimate(tq, tk, num_heads, hd, d_out, out_bytes):
    """Rough per-step VMEM footprint of pass 2 (double-buffered I/O + scratch)."""
    b = 0
    b += 2 * (tq * d_out * 2)                       # Q double-buffer (bf16)
    b += 2 * 2 * (tk * d_out * 2)                   # K + V double-buffers
    b += 2 * (d_out * d_out * 2)                    # Wo (bf16)
    b += 2 * (tq * d_out * out_bytes)               # output double-buffer
    b += 2 * (num_heads * tq * 128 * 4)             # m, l (lane-padded to 128)
    b += num_heads * tq * max(hd, 128) * 4          # acc (lane-padded)
    b += 4 * (num_heads * tq * tk * 4)              # s / p / mask live values
    return b


def _fit_tiles(tq, tk, t, num_heads, hd, d_out, out_bytes, vmem_limit):
    budget = int(vmem_limit * 0.6)
    while (_pass2_vmem_estimate(tq, tk, num_heads, hd, d_out, out_bytes) > budget
           and tk >= 16 and (tk // 2) % 8 == 0 and t % (tk // 2) == 0):
        tk //= 2
    while (_pass2_vmem_estimate(tq, tk, num_heads, hd, d_out, out_bytes) > budget
           and tq >= 16 and (tq // 2) % 8 == 0 and t % (tq // 2) == 0):
        tq //= 2
    return tq, tk


# ---------------------------------------------------------------------------
# Wrapper.
# ---------------------------------------------------------------------------
def multi_head_attention(x, w_query, w_key, w_value, w_out, b_out, num_heads,
                         *, q_block=None, kv_block=None):
    """x: (B, T, d_in); w_query/key/value: (d_in, d_out); w_out: (d_out, d_out);
    b_out: (d_out,).  Returns (B, T, d_out). Eval-mode forward (dropout = identity)."""
    B, T, d_in = x.shape
    d_out = w_query.shape[1]
    assert d_out % num_heads == 0, "d_out must be divisible by num_heads"
    hd = d_out // num_heads
    H = num_heads
    out_dtype = x.dtype
    out_bytes = jnp.dtype(out_dtype).itemsize
    vmem_limit = _vmem_limit_bytes()

    tq = _pick_seq_tile(T, q_block)
    tk = _pick_seq_tile(T, kv_block)
    tq, tk = _fit_tiles(tq, tk, T, H, hd, d_out, out_bytes, vmem_limit)
    tt = tq  # projection tile

    # Pre-cast to bf16 once in the wrapper: halves weight DMA bytes / VMEM and
    # removes per-grid-step casts of resident weight blocks.
    x_bf = x.astype(jnp.bfloat16)
    wq_bf = w_query.astype(jnp.bfloat16)
    wk_bf = w_key.astype(jnp.bfloat16)
    wv_bf = w_value.astype(jnp.bfloat16)
    wo_bf = w_out.astype(jnp.bfloat16)
    bo = b_out.astype(jnp.float32).reshape(1, d_out)

    scale = 1.0 / math.sqrt(hd)

    # ---------------- Pass 1: head-major Q, K, V projections ----------------
    qkv_kernel = functools.partial(_qkv_proj_kernel, num_heads=H, scale=scale)
    q, k, v = pl.pallas_call(
        qkv_kernel,
        out_shape=[jax.ShapeDtypeStruct((B, H, T, hd), jnp.bfloat16)] * 3,
        grid_spec=pltpu.PrefetchScalarGridSpec(
            num_scalar_prefetch=0,
            grid=(B, T // tt),
            in_specs=[
                pl.BlockSpec((1, tt, d_in), lambda b, i: (b, i, 0)),    # x tile
                pl.BlockSpec((d_in, d_out), lambda b, i: (0, 0)),       # Wq (resident)
                pl.BlockSpec((d_in, d_out), lambda b, i: (0, 0)),       # Wk
                pl.BlockSpec((d_in, d_out), lambda b, i: (0, 0)),       # Wv
            ],
            out_specs=[
                pl.BlockSpec((1, H, tt, hd), lambda b, i: (b, 0, i, 0)),
                pl.BlockSpec((1, H, tt, hd), lambda b, i: (b, 0, i, 0)),
                pl.BlockSpec((1, H, tt, hd), lambda b, i: (b, 0, i, 0)),
            ],
        ),
        compiler_params=pltpu.CompilerParams(
            dimension_semantics=("parallel", "parallel"),
            vmem_limit_bytes=vmem_limit,
        ),
    )(x_bf, wq_bf, wk_bf, wv_bf)

    # ---------------- Pass 2: flash attention + output projection -----------
    # Clamp the K/V block index so fully-masked (future) KV tiles are never
    # re-fetched from HBM: consecutive equal block indices skip the DMA.
    last_kv = lambda qi: (qi * tq + tq - 1) // tk
    kv_index_map = lambda b, qi, ki: (b, 0, jnp.minimum(ki, last_kv(qi)), 0)

    out = pl.pallas_call(
        _flash_attn_kernel,
        out_shape=jax.ShapeDtypeStruct((B, T, d_out), out_dtype),
        grid_spec=pltpu.PrefetchScalarGridSpec(
            num_scalar_prefetch=0,
            grid=(B, T // tq, T // tk),
            in_specs=[
                pl.BlockSpec((1, H, tq, hd), lambda b, qi, ki: (b, 0, qi, 0)),  # Q
                pl.BlockSpec((1, H, tk, hd), kv_index_map),                     # K
                pl.BlockSpec((1, H, tk, hd), kv_index_map),                     # V
                pl.BlockSpec((d_out, d_out), lambda b, qi, ki: (0, 0)),         # Wo
                pl.BlockSpec((1, d_out), lambda b, qi, ki: (0, 0)),             # bias
            ],
            out_specs=pl.BlockSpec((1, tq, d_out), lambda b, qi, ki: (b, qi, 0)),
            scratch_shapes=[
                pltpu.VMEM((H, tq, 1), jnp.float32),    # m
                pltpu.VMEM((H, tq, 1), jnp.float32),    # l
                pltpu.VMEM((H, tq, hd), jnp.float32),   # acc
            ],
        ),
        compiler_params=pltpu.CompilerParams(
            dimension_semantics=("parallel", "parallel", "arbitrary"),
            vmem_limit_bytes=vmem_limit,
        ),
    )(q, k, v, wo_bf, bo)
    return out


# ---------------------------------------------------------------------------
# Plain-JAX f32 reference mirroring the PyTorch forward pass (eval mode).
# ---------------------------------------------------------------------------
def _reference_mha(x, w_query, w_key, w_value, w_out, b_out, num_heads):
    B, T, d_in = x.shape
    d_out = w_query.shape[1]
    hd = d_out // num_heads

    q = (x @ w_query).reshape(B, T, num_heads, hd).transpose(0, 2, 1, 3)
    k = (x @ w_key).reshape(B, T, num_heads, hd).transpose(0, 2, 1, 3)
    v = (x @ w_value).reshape(B, T, num_heads, hd).transpose(0, 2, 1, 3)

    scores = jnp.einsum("bhqd,bhkd->bhqk", q, k) / math.sqrt(hd)
    mask = jnp.triu(jnp.ones((T, T), dtype=bool), k=1)
    scores = jnp.where(mask, -jnp.inf, scores)
    attn = jax.nn.softmax(scores, axis=-1)
    ctx = jnp.einsum("bhqk,bhkd->bhqd", attn, v).transpose(0, 2, 1, 3)
    ctx = ctx.reshape(B, T, d_out)
    return ctx @ w_out + b_out


if __name__ == "__main__":
    # Small shapes consistent with the module's forward pass.
    B, T, d_in, d_out, num_heads = 2, 16, 32, 32, 4
    context_length = T
    dropout_p = 0.0  # eval-mode / p=0 dropout

    key = jax.random.PRNGKey(0)
    kx, kq, kk, kv, ko, kb = jax.random.split(key, 6)

    x = jax.random.normal(kx, (B, T, d_in), dtype=jnp.float32)

    # Deterministic synthetic parameters (effective (in, out) orientation).
    w_query = jax.random.normal(kq, (d_in, d_out), dtype=jnp.float32) * 0.1
    w_key = jax.random.normal(kk, (d_in, d_out), dtype=jnp.float32) * 0.1
    w_value = jax.random.normal(kv, (d_in, d_out), dtype=jnp.float32) * 0.1
    w_out = jax.random.normal(ko, (d_out, d_out), dtype=jnp.float32) * 0.1
    b_out = jax.random.normal(kb, (d_out,), dtype=jnp.float32) * 0.1

    # 8-row tiles so the demo exercises multiple Q/KV tiles, the causal
    # block-skip + clamped DMA, the no-mask fast path, and the online softmax.
    out = multi_head_attention(x, w_query, w_key, w_value, w_out, b_out,
                               num_heads, q_block=8, kv_block=8)
    out = jax.block_until_ready(out)

    ref = _reference_mha(x, w_query, w_key, w_value, w_out, b_out, num_heads)
    assert out.shape == (B, T, d_out)
    # bf16 MXU operands + approx reciprocal -> relaxed (but tight-enough) tolerance.
    assert jnp.allclose(out, ref, atol=2e-2, rtol=2e-2), "mismatch vs reference"

    print("KERNEL_OK")
</pallas_src>

<mosaic_0001>
module attributes {stable_mosaic.version = 11 : i64} {
  func.func @_qkv_proj_kernel(%arg0: i32, %arg1: i32, %arg2: memref<1x8x32xbf16, #tpu.memory_space<vmem>>, %arg3: memref<32x32xbf16, #tpu.memory_space<vmem>>, %arg4: memref<32x32xbf16, #tpu.memory_space<vmem>>, %arg5: memref<32x32xbf16, #tpu.memory_space<vmem>>, %arg6: memref<1x4x8x8xbf16, #tpu.memory_space<vmem>>, %arg7: memref<1x4x8x8xbf16, #tpu.memory_space<vmem>>, %arg8: memref<1x4x8x8xbf16, #tpu.memory_space<vmem>>) attributes {dimension_semantics = [#tpu.dimension_semantics<parallel>, #tpu.dimension_semantics<parallel>], iteration_bounds = array<i64: 2, 2>, scalar_prefetch = 0 : i64, scratch_operands = 0 : i64, tpu.core_type = #tpu.core_type<tc>, window_params = [{transform_indices = @transform_0, window_bounds = array<i64: 1, 8, 32>}, {pipeline_mode = #tpu.pipeline_mode<synchronous>, transform_indices = @transform_1, window_bounds = array<i64: 32, 32>}, {pipeline_mode = #tpu.pipeline_mode<synchronous>, transform_indices = @transform_2, window_bounds = array<i64: 32, 32>}, {pipeline_mode = #tpu.pipeline_mode<synchronous>, transform_indices = @transform_3, window_bounds = array<i64: 32, 32>}, {transform_indices = @transform_4, window_bounds = array<i64: 1, 4, 8, 8>}, {transform_indices = @transform_5, window_bounds = array<i64: 1, 4, 8, 8>}, {transform_indices = @transform_6, window_bounds = array<i64: 1, 4, 8, 8>}]} {
    %c0 = arith.constant 0 : index
    %c0_0 = arith.constant 0 : index
    %c0_1 = arith.constant 0 : index
    %0 = vector.load %arg2[%c0, %c0_0, %c0_1] : memref<1x8x32xbf16, #tpu.memory_space<vmem>>, vector<1x8x32xbf16>
    %1 = vector.shape_cast %0 : vector<1x8x32xbf16> to vector<8x32xbf16>
    %c0_2 = arith.constant 0 : index
    %c0_3 = arith.constant 0 : index
    %2 = vector.load %arg3[%c0_2, %c0_3] : memref<32x32xbf16, #tpu.memory_space<vmem>>, vector<32x32xbf16>
    %cst = arith.constant dense<0.000000e+00> : vector<8x32xf32>
    %3 = tpu.matmul %1, %2, %cst {dimension_numbers = #tpu.dot_dimension_numbers<[1], [0], [0], [1], [0, 0, 1, 1], [], []>} : vector<8x32xbf16>, vector<32x32xbf16>, vector<8x32xf32> -> vector<8x32xf32>
    %cst_4 = arith.constant 0.353553385 : f32
    %4 = vector.broadcast %cst_4 : f32 to vector<8x32xf32>
    %5 = arith.mulf %3, %4 : vector<8x32xf32>
    %6 = vector.shape_cast %5 : vector<8x32xf32> to vector<8x4x8xf32>
    %7 = tpu.transpose %6, [1, 0, 2] : vector<8x4x8xf32> -> vector<4x8x8xf32>
    %8 = arith.truncf %7 : vector<4x8x8xf32> to vector<4x8x8xbf16>
    %c0_5 = arith.constant 0 : index
    %c0_6 = arith.constant 0 : index
    %c0_7 = arith.constant 0 : index
    %c0_8 = arith.constant 0 : index
    %9 = vector.load %arg6[%c0_5, %c0_6, %c0_7, %c0_8] : memref<1x4x8x8xbf16, #tpu.memory_space<vmem>>, vector<1x4x8x8xbf16>
    %10 = vector.shape_cast %9 : vector<1x4x8x8xbf16> to vector<4x8x8xbf16>
    %11 = vector.shape_cast %8 : vector<4x8x8xbf16> to vector<1x4x8x8xbf16>
    tpu.vector_store %arg6[%c0_5, %c0_6, %c0_7, %c0_8], %11 {strides = array<i32>} : memref<1x4x8x8xbf16, #tpu.memory_space<vmem>>, vector<1x4x8x8xbf16>,
    %c0_9 = arith.constant 0 : index
    %c0_10 = arith.constant 0 : index
    %12 = vector.load %arg4[%c0_9, %c0_10] : memref<32x32xbf16, #tpu.memory_space<vmem>>, vector<32x32xbf16>
    %cst_11 = arith.constant dense<0.000000e+00> : vector<8x32xf32>
    %13 = tpu.matmul %1, %12, %cst_11 {dimension_numbers = #tpu.dot_dimension_numbers<[1], [0], [0], [1], [0, 0, 1, 1], [], []>} : vector<8x32xbf16>, vector<32x32xbf16>, vector<8x32xf32> -> vector<8x32xf32>
    %14 = vector.shape_cast %13 : vector<8x32xf32> to vector<8x4x8xf32>
    %15 = tpu.transpose %14, [1, 0, 2] : vector<8x4x8xf32> -> vector<4x8x8xf32>
    %16 = arith.truncf %15 : vector<4x8x8xf32> to vector<4x8x8xbf16>
    %c0_12 = arith.constant 0 : index
    %c0_13 = arith.constant 0 : index
    %c0_14 = arith.constant 0 : index
    %c0_15 = arith.constant 0 : index
    %17 = vector.load %arg7[%c0_12, %c0_13, %c0_14, %c0_15] : memref<1x4x8x8xbf16, #tpu.memory_space<vmem>>, vector<1x4x8x8xbf16>
    %18 = vector.shape_cast %17 : vector<1x4x8x8xbf16> to vector<4x8x8xbf16>
    %19 = vector.shape_cast %16 : vector<4x8x8xbf16> to vector<1x4x8x8xbf16>
    tpu.vector_store %arg7[%c0_12, %c0_13, %c0_14, %c0_15], %19 {strides = array<i32>} : memref<1x4x8x8xbf16, #tpu.memory_space<vmem>>, vector<1x4x8x8xbf16>,
    %c0_16 = arith.constant 0 : index
    %c0_17 = arith.constant 0 : index
    %20 = vector.load %arg5[%c0_16, %c0_17] : memref<32x32xbf16, #tpu.memory_space<vmem>>, vector<32x32xbf16>
    %cst_18 = arith.constant dense<0.000000e+00> : vector<8x32xf32>
    %21 = tpu.matmul %1, %20, %cst_18 {dimension_numbers = #tpu.dot_dimension_numbers<[1], [0], [0], [1], [0, 0, 1, 1], [], []>} : vector<8x32xbf16>, vector<32x32xbf16>, vector<8x32xf32> -> vector<8x32xf32>
    %22 = vector.shape_cast %21 : vector<8x32xf32> to vector<8x4x8xf32>
    %23 = tpu.transpose %22, [1, 0, 2] : vector<8x4x8xf32> -> vector<4x8x8xf32>
    %24 = arith.truncf %23 : vector<4x8x8xf32> to vector<4x8x8xbf16>
    %c0_19 = arith.constant 0 : index
    %c0_20 = arith.constant 0 : index
    %c0_21 = arith.constant 0 : index
    %c0_22 = arith.constant 0 : index
    %25 = vector.load %arg8[%c0_19, %c0_20, %c0_21, %c0_22] : memref<1x4x8x8xbf16, #tpu.memory_space<vmem>>, vector<1x4x8x8xbf16>
    %26 = vector.shape_cast %25 : vector<1x4x8x8xbf16> to vector<4x8x8xbf16>
    %27 = vector.shape_cast %24 : vector<4x8x8xbf16> to vector<1x4x8x8xbf16>
    tpu.vector_store %arg8[%c0_19, %c0_20, %c0_21, %c0_22], %27 {strides = array<i32>} : memref<1x4x8x8xbf16, #tpu.memory_space<vmem>>, vector<1x4x8x8xbf16>,
    return
  }
  func.func @transform_0(%arg0: i32, %arg1: i32) -> (i32, i32, i32) {
    %c0_i32 = arith.constant 0 : i32
    %c0_i32_0 = arith.constant 0 : i32
    return %arg0, %arg1, %c0_i32 : i32, i32, i32
  }
  func.func @transform_1(%arg0: i32, %arg1: i32) -> (i32, i32) {
    %c0_i32 = arith.constant 0 : i32
    %c0_i32_0 = arith.constant 0 : i32
    %c0_i32_1 = arith.constant 0 : i32
    return %c0_i32, %c0_i32_0 : i32, i32
  }
  func.func @transform_2(%arg0: i32, %arg1: i32) -> (i32, i32) {
    %c0_i32 = arith.constant 0 : i32
    %c0_i32_0 = arith.constant 0 : i32
    %c0_i32_1 = arith.constant 0 : i32
    return %c0_i32, %c0_i32_0 : i32, i32
  }
  func.func @transform_3(%arg0: i32, %arg1: i32) -> (i32, i32) {
    %c0_i32 = arith.constant 0 : i32
    %c0_i32_0 = arith.constant 0 : i32
    %c0_i32_1 = arith.constant 0 : i32
    return %c0_i32, %c0_i32_0 : i32, i32
  }
  func.func @transform_4(%arg0: i32, %arg1: i32) -> (i32, i32, i32, i32) {
    %c0_i32 = arith.constant 0 : i32
    %c0_i32_0 = arith.constant 0 : i32
    %c0_i32_1 = arith.constant 0 : i32
    return %arg0, %c0_i32, %arg1, %c0_i32_0 : i32, i32, i32, i32
  }
  func.func @transform_5(%arg0: i32, %arg1: i32) -> (i32, i32, i32, i32) {
    %c0_i32 = arith.constant 0 : i32
    %c0_i32_0 = arith.constant 0 : i32
    %c0_i32_1 = arith.constant 0 : i32
    return %arg0, %c0_i32, %arg1, %c0_i32_0 : i32, i32, i32, i32
  }
  func.func @transform_6(%arg0: i32, %arg1: i32) -> (i32, i32, i32, i32) {
    %c0_i32 = arith.constant 0 : i32
    %c0_i32_0 = arith.constant 0 : i32
    %c0_i32_1 = arith.constant 0 : i32
    return %arg0, %c0_i32, %arg1, %c0_i32_0 : i32, i32, i32, i32
  }
}

</mosaic_0001>

<bundles_post_ra>
// kernel: tpu_custom_call.1
= control target key start
LH: loop header
LB: loop body
LE: loop exit
PB: predicated region body
PF: predicated region fallthrough
CT: control target
= control target key end

     0   :  { %s2152_s0 = inlined_call_operand.hbm [shape: bf16[2,16,32], index: 0, kind: input, shape index: {}]   ;;  %s2153_s1 = inlined_call_operand.hbm [shape: bf16[32,32], index: 1, kind: input, shape index: {}]   ;;  %s2154_s2 = inlined_call_operand.hbm [shape: bf16[32,32], index: 2, kind: input, shape index: {}]   ;;  %s2155_s3 = inlined_call_operand.hbm [shape: bf16[32,32], index: 3, kind: input, shape index: {}]   ;;  %s2156_s4 = inlined_call_operand.vmem [shape: bf16[2,4,16,8], index: 4, kind: output, shape index: {0}]   ;;  %s2157_s5 = inlined_call_operand.vmem [shape: bf16[2,4,16,8], index: 5, kind: output, shape index: {1}]   ;;  %s2158_s6 = inlined_call_operand.vmem [shape: bf16[2,4,16,8], index: 6, kind: output, shape index: {2}]  }
   0x1   :  { %2165 = sst [smem:[#allocation16_spill]] %s2153_s1 }
   0x2   :  { %2166 = sst [smem:[#allocation17_spill]] %s2154_s2 }
   0x3   :  { %2167 = sst [smem:[#allocation18_spill]] %s2155_s3 }
   0x4   :  { %2168 = sst [smem:[#allocation19_spill]] %s2158_s6 }
   0x5   :  { %12 = vsyncpa [#allocation3], 0 }
   0x6   :  { %14 = vsyncpa [#allocation3 + $0x1], 0 }
   0x7   :  { %15 = vsyncpa [#allocation5], 0 }
   0x8   :  { %16 = vsyncpa [#allocation8], 0  ;;  %s1764_s21 = smov 0   ;;  %s1766_s22 = smov 0  }
   0x9   :  { %s1768_s23 = smov 0   ;;  %s1770_s24 = smov 0  }
   0xa   :  { %s1772_s25 = smov 0   ;;  %s1774_s26 = smov 0  }
   0xb   :  { %s1776_s27 = smov 0   ;;  %s1778_s28 = smov 0  }
   0xc LB: > { %s2163_s29 = sadd.s32 4294967295, %s1714_s28   ;;  %p56_p0 = scmp.ne.s32.totalorder %s1690_s22, %s1686_s21  ;;  %s1714_s28 = sphi %s1778_s28, %s22_s28   ;;  %s1710_s27 = sphi %s1776_s27, %s2193_s27   ;;  %s1706_s26 = sphi %s1774_s26, %s2192_s26   ;;  %s1702_s25 = sphi %s1772_s25, %s2191_s25   ;;  %s1698_s24 = sphi %s1770_s24, %s2190_s24   ;;  %s1694_s23 = sphi %s1768_s23, %s2189_s23   ;;  %s1690_s22 = sphi %s1766_s22, %s2188_s22   ;;  %s1686_s21 = sphi %s1764_s21, %s2187_s21  }
   0xd   : > { %p1806_p1 = scmp.eq.s32.totalorder %s2163_s29, 0  ;;  %p1334_p2 = scmp.ge.s32.totalorder %s1714_s28, 1 }
   0xe   : > { %p214_p3 = scmp.lt.s32.totalorder %s1714_s28, 5  ;;  %s1716_s9 = smov [#allocation4]  }
   0xf   : > { %s2169_s30 = scalar_select %p1806_p1, 1, 0 }
  0x10   : > { %p1814_p4 = por %p1806_p1, %p56_p0  ;;  %p1818_p5 = pnand %p1334_p2, %p214_p3 }
  0x11   : > { %s226_s10 = sshll.u32 %s1716_s9, 4  ;;  %s1717_s12 = smov [#allocation6]   ;;  %s227_s10 = int_to_ptr.vmem [resolvable:$true] %s226_s10 }
  0x12   : > { %s2170_s7 = scalar_select %p1814_p4, 1, 0 }
  0x13   : > { %s2171_s8 = scalar_select %p1818_p5, 1, 0 }
  0x14   : > { %p1423_p6 = pneg %p1818_p5  ;;  %s239_s13 = sshll.u32 %s1717_s12, 4  ;;  %s1830_s13 = int_to_ptr.vmem [resolvable:$true] %s239_s13 }
  0x15   : > { %s2173_s1 = sld [smem:[#allocation16_spill]] }
  0x16   : > { %p1826_p7 = pnand %p1423_p6, %p1806_p1 }
  0x18   : > { %p1840_p9 = pneg %p1826_p7 }
  0x1b   : > { %s1526_s16 = scalar_lea.hbm %s2173_s1, 256 }
  0x1c   : > { %p1527_p8 = scmp.ne.s32.totalorder %s2173_s1, %s1526_s16  ;;  %p1533_p12 = scmp.lt.u32.totalorder %s1526_s16, %s2173_s1 }
  0x1e   : > { %p1529_p10 = pnand %p1840_p9, %p1527_p8 }
  0x20   : > { %p1530_p11 = pneg %p1529_p10 }
  0x22   : > { %p1535_p13 = pnand %p1533_p12, %p1530_p11 }
  0x24   : > { %1538 = shalt.err (!%p1535_p13)
}
  0x25   : > { %s1539_s9 = scalar_lea.vmem %s227_s10, 256  ;;  %p1547_p6 = scmp.lt.s32.totalorder %s227_s10, %s227_s10 }
  0x26   : > { %p1540_p0 = scmp.ne.s32.totalorder %s227_s10, %s1539_s9  ;;  %p1548_p1 = scmp.lt.s32.totalorder %s1539_s9, %s1539_s9 }
  0x28   : > { %p1542_p2 = pnand %p1540_p0, %p1840_p9  ;;  %p1549_p4 = por %p1548_p1, %p1547_p6 }
  0x2a   : > { %p1543_p3 = pneg %p1542_p2 }
  0x2c   : > { %p1550_p5 = pnand %p1549_p4, %p1543_p3 }
  0x2e   : > { %1553 = shalt.err (!%p1550_p5)
}
  0x2f   : > { %s1718_s12 = smov 64   ;;  %s1719_s14 = smov 4  }
  0x30   : > { %1426 = dma.hbm_to_vmem [thread:$0]  (!%p1826_p7), %s2173_s1, 256, %s227_s10, [#allocation5], %s1718_s12, %s1718_s12, %s1719_s14  }
  0x31   : > { %s2175_s2 = sld [smem:[#allocation17_spill]] }
  0x37   : > { %s1554_s20 = scalar_lea.hbm %s2175_s2, 256 }
  0x38   : > { %p1555_p1 = scmp.ne.s32.totalorder %s2175_s2, %s1554_s20  ;;  %p1561_p8 = scmp.lt.u32.totalorder %s1554_s20, %s2175_s2 }
  0x3a   : > { %p1557_p4 = pnand %p1555_p1, %p1840_p9 }
  0x3c   : > { %p1558_p5 = pneg %p1557_p4 }
  0x3e   : > { %p1563_p10 = pnand %p1561_p8, %p1558_p5 }
  0x40   : > { %1566 = shalt.err (!%p1563_p10)
}
  0x41   : > { %s1567_s10 = scalar_lea.vmem %s1830_s13, 256  ;;  %p1575_p0 = scmp.lt.s32.totalorder %s1830_s13, %s1830_s13 }
  0x42   : > { %p1568_p11 = scmp.ne.s32.totalorder %s1830_s13, %s1567_s10  ;;  %p1576_p2 = scmp.lt.s32.totalorder %s1567_s10, %s1567_s10 }
  0x44   : > { %p1570_p12 = pnand %p1568_p11, %p1840_p9  ;;  %p1577_p3 = por %p1576_p2, %p1575_p0 }
  0x46   : > { %p1571_p13 = pneg %p1570_p12 }
  0x48   : > { %p1578_p6 = pnand %p1577_p3, %p1571_p13 }
  0x4a   : > { %1581 = shalt.err (!%p1578_p6)
}
  0x4b   : > { %1429 = dma.hbm_to_vmem [thread:$0]  (!%p1826_p7), %s2175_s2, 256, %s1830_s13, [#allocation5], %s1718_s12, %s1718_s12, %s1719_s14  }
  0x4c   : > { %s1720_s15 = smov [#allocation7]   ;;  %s2176_s3 = sld [smem:[#allocation18_spill]] }
  0x4d   : > { %s252_s16 = sshll.u32 %s1720_s15, 4  ;;  %s253_s16 = int_to_ptr.vmem [resolvable:$true] %s252_s16 }
  0x52   : > { %s1582_s20 = scalar_lea.hbm %s2176_s3, 256 }
  0x53   : > { %p1583_p1 = scmp.ne.s32.totalorder %s2176_s3, %s1582_s20  ;;  %p1589_p8 = scmp.lt.u32.totalorder %s1582_s20, %s2176_s3 }
  0x55   : > { %p1585_p4 = pnand %p1583_p1, %p1840_p9 }
  0x57   : > { %p1586_p5 = pneg %p1585_p4 }
  0x59   : > { %p1591_p10 = pnand %p1589_p8, %p1586_p5 }
  0x5b   : > { %1594 = shalt.err (!%p1591_p10)
}
  0x5c   : > { %s1595_s13 = scalar_lea.vmem %s253_s16, 256  ;;  %p1603_p0 = scmp.lt.s32.totalorder %s253_s16, %s253_s16 }
  0x5d   : > { %p1596_p11 = scmp.ne.s32.totalorder %s253_s16, %s1595_s13  ;;  %p1604_p2 = scmp.lt.s32.totalorder %s1595_s13, %s1595_s13 }
  0x5f   : > { %p1598_p12 = pnand %p1596_p11, %p1840_p9  ;;  %p1605_p3 = por %p1604_p2, %p1603_p0 }
  0x61   : > { %p1599_p13 = pneg %p1598_p12 }
  0x63   : > { %p1606_p6 = pnand %p1605_p3, %p1599_p13 }
  0x65   : > { %1609 = shalt.err (!%p1606_p6)
}
  0x66   : > { %1432 = dma.hbm_to_vmem [thread:$0]  (!%p1826_p7), %s2176_s3, 256, %s253_s16, [#allocation8], %s1718_s12, %s1718_s12, %s1719_s14  }
  0x67   : > { %s2177_s19 = sadd.s32 4294967295, %s1714_s28   ;;  %s31_s11 = sadd.s32 1, %s1706_s26 }
  0x68   : > { %p145_p9 = scmp.eq.s32.totalorder %s2177_s19, 3  ;;  %p32_p1 = scmp.ge.s32.totalorder %s31_s11, 2 }
  0x69   : > { %s34_s29 = sadd.s32 1, %s1710_s27  ;;  %p50_p4 = scmp.ne.s32.totalorder %s1694_s23, %s1690_s22 }
  0x6a   : > { %p51_p5 = scmp.eq.s32.totalorder %s1714_s28, 0  ;;  %s2195_s11 = smov (%p32_p1, %s31_s11), 0 }
  0x6b   : > { %2178 = sst [smem:[#allocation15_spill]] %s2195_s11  ;;  %s2197_s29 = smov (!%p32_p1, %s34_s29), %s1710_s27 }
  0x6c   : > { %s39_s15 = ssub.s32 %s1706_s26, %s2195_s11  ;;  %s43_s17 = sadd.s32 1, %s1694_s23 }
  0x6d   : > { %p36_p8 = scmp.ge.s32.totalorder %s2197_s29, 2  ;;  %p1919_p7 = por %p145_p9, %p50_p4 }
  0x6e   : > { %p1923_p10 = por %p51_p5, %p50_p4  ;;  %s266_s16 = sand.u32 1, %s1694_s23  }
  0x6f   : > { %s2199_s29 = smov (%p36_p8, %s2197_s29), 0  ;;  %p1440_p11 = scmp.lt.s32.totalorder %s1714_s28, 4 }
  0x70   : > { %s1339_s18 = sshll.u32 %s266_s16, 2  ;;  %s38_s20 = ssub.s32 %s1710_s27, %s2199_s29 }
  0x71   : > { %s40_s21 = sor.u32 %s39_s15, %s38_s20  ;;  %s1340_s9 = sshll.u32 %s1710_s27, 1 }
  0x72   : > { %p41_p12 = scmp.eq.s32.totalorder %s40_s21, 0  ;;  %s275_s10 = sadd.s32 %s1706_s26, %s1340_s9 }
  0x73   : > { %s1341_s13 = sshll.u32 %s275_s10, 6  ;;  %s270_s1 = scalar_lea.vmem [#allocation2], %s1339_s18 }
  0x74   : > { %s279_s6 = sshll.u32 %s270_s1, 4  ;;  %s1941_s11 = scalar_lea.hbm %s2152_s0, %s1341_s13  ;;  %s1943_s6 = int_to_ptr.vmem [resolvable:$true] %s279_s6 }
  0x75   : > { %s1936_s19 = scalar_select %p41_p12, %s1694_s23, %s43_s17  }
  0x76   : > { %p1949_p13 = pnand %p1440_p11, %p1923_p10  ;;  %s267_s17 = scalar_lea.sflag [#allocation3], %s266_s16 }
  0x77   : > { %s1610_s18 = scalar_lea.hbm %s1941_s11, 64  ;;  %s1615_s14 = scalar_lea.hbm %s2152_s0, 256 }
  0x78   : > { %p1611_p0 = scmp.ne.s32.totalorder %s1941_s11, %s1610_s18  ;;  %p1612_p2 = pneg %p1949_p13 }
  0x79   : > { %p1616_p9 = scmp.lt.u32.totalorder %s1941_s11, %s2152_s0  ;;  %p1617_p1 = scmp.lt.u32.totalorder %s1615_s14, %s1610_s18 }
  0x7a   : > { %p1613_p3 = pnand %p1612_p2, %p1611_p0  ;;  %p1619_p5 = scmp.lt.u32.totalorder %s1610_s18, %s1941_s11 }
  0x7b   : > { %p1618_p4 = por %p1617_p1, %p1616_p9 }
  0x7c   : > { %p1614_p6 = pneg %p1613_p3 }
  0x7d   : > { %p1620_p8 = por %p1619_p5, %p1618_p4 }
  0x7f   : > { %p1621_p10 = pnand %p1620_p8, %p1614_p6 }
  0x81   : > { %1624 = shalt.err (!%p1621_p10)
}
  0x82   : > { %s1625_s16 = scalar_lea.vmem %s1943_s6, 64  ;;  %s1721_s9 = smov [#allocation2]  }
  0x83   : > { %p1626_p11 = scmp.ne.s32.totalorder %s1943_s6, %s1625_s16  ;;  %s1630_s10 = sshll.u32 %s1721_s9, 4  ;;  %s1631_s10 = int_to_ptr.vmem [resolvable:$false] %s1630_s10 }
  0x84   : > { %s1632_s13 = scalar_lea.vmem %s1631_s10, 128  ;;  %p1633_p3 = scmp.lt.s32.totalorder %s1943_s6, %s1631_s10 }
  0x85   : > { %p1628_p12 = pnand %p1626_p11, %p1612_p2  ;;  %p1634_p9 = scmp.lt.s32.totalorder %s1632_s13, %s1625_s16 }
  0x87   : > { %p1629_p0 = pneg %p1628_p12  ;;  %p1635_p1 = por %p1634_p9, %p1633_p3 }
  0x89   : > { %p1636_p4 = pnand %p1635_p1, %p1629_p0 }
  0x8b   : > { %1639 = shalt.err (!%p1636_p4)
}
  0x8c   : > { %1436 = dma.hbm_to_vmem [thread:$0]  (!%p1949_p13), %s1941_s11, 64, %s1943_s6, %s267_s17  }
  0x8d   : > { %p2182_p6 = scmp.ne.s32.totalorder %s2171_s8, 0 }
  0x8e   : > { %s1981_s1 = sand.u32 (!%p2182_p6), 1, %s1690_s22   ;;  %p2183_p2 = scmp.ne.s32.totalorder (!%p2182_p6), %s2170_s7, 0 }
  0x8f   : > { %288 = sbr.rel (%p2182_p6) target bundleno = 557 (0x22d), region = 36  ;;  %s1343_s18 = sshll.u32 (!%p2182_p6), %s1981_s1, 2 }
  0x90   : > { %s291_s2 = scalar_lea.sflag (!%p2182_p6), [#allocation3], %s1981_s1  ;;  %s294_s3 = scalar_lea.vmem (!%p2182_p6), [#allocation2], %s1343_s18 }
  0x96   : > { %1673 = dma.done.wait (%p2183_p2), %s291_s2, 64  }
  0x97   : > { %1675 = vsyncadd (%p2183_p2), %s291_s2, 4294967232  ;;  %p2184_p5 = scmp.ne.s32.totalorder %s2169_s30, 0 }
  0x99   : > { %1677 = dma.done.wait (%p2184_p5), [#allocation5], 512  }
  0x9a   : > { %1679 = vsyncadd (%p2184_p5), [#allocation5], 4294966784 }
  0x9b   : > { %1681 = dma.done.wait (%p2184_p5), [#allocation8], 256  }
  0x9c   : > { %1683 = vsyncadd (%p2184_p5), [#allocation8], 4294967040  ;;  %v1722_v0 = vmov 0.0   ;;  %vm1723_vm0 = vmmov 0   ;;  %v1520_v1 = vld [vmem:[#allocation4] sm:$0xff]   ;;  %v1521_v2 = vld [vmem:[#allocation6] sm:$0xff]   ;;  %v420_v23 = vlaneseq }
  0x9d   : > { %1385 = vmatprep.subr.bf16.mxu0 %v1722_v0  ;;  %1393 = vmatprep.subr.bf16.mxu1 %v1722_v0  ;;  %v1522_v3 = vld [vmem:[#allocation4 + $0x8] sm:$0xff]   ;;  %v1523_v4 = vld [vmem:[#allocation6 + $0x8] sm:$0xff]   ;;  %vm360_vm1 = vcmask 261120   ;;  %v1524_v6 = vld [vmem:[#allocation7] sm:$0xff]   ;;  %s1724_s30 = smov 112   ;;  %s1725_s7 = smov 120  }
  0x9e   : > { %1389 = vmatprep.mubr.msk.bf16.mxu0 %vm1723_vm0, %v1722_v0  ;;  %1397 = vmatprep.mubr.msk.bf16.mxu1 %vm1723_vm0, %v1722_v0  ;;  %v343_v5 = vld [vmem:[%s294_s3] sm:$0xf]  ;;  %v1525_v7 = vld [vmem:[#allocation7 + $0x8] sm:$0xff]   ;;  %s1726_s8 = smov 104   ;;  %v1727_v21 = vmov 1983009808  }
  0x9f   : > { %1386 = vmatpush3.bf16.msra.mxu0 %v1520_v1  ;;  %1394 = vmatpush3.bf16.msra.mxu1 %v1521_v2  ;;  %v418_v22 = vunpack.c.l.s4 %v1727_v21  ;;  %v1728_v24 = vmov 1934713408   ;;  %v421_v27 = vshrl.u32 %v420_v23, 7  ;;  %vm555_vm2 = vcmask 60416   ;;  %s2030_s11 = sshll.u32 %s1981_s1, 4  ;;  %s1368_s14 = sshll.u32 (%p1919_p7), %s1702_s25, 3 }
  0xa0   : > { %1387 = vmatprep.subr.bf16.mxu0 %v1722_v0  ;;  %1395 = vmatprep.subr.bf16.mxu1 %v1722_v0  ;;  %v450_v25 = vunpack.c.l.s4 %v1728_v24  ;;  %s2045_s6 = scalar_lea.vmem [#allocation10], %s2030_s11  ;;  %s2062_s15 = scalar_lea.vmem [#allocation9], %s2030_s11 }
  0xa1   : > { %v419_v26 = vunpack.c.0.s8 %v418_v22  ;;  %s2085_s17 = scalar_lea.vmem [#allocation11], %s2030_s11  ;;  %s996_s20 = sadd.s32 (%p1919_p7), %s1698_s24, %s1368_s14 }
  0xa2   : > { %v451_v30 = vunpack.c.0.s8 %v450_v25  ;;  %s1369_s21 = sshll.u32 (%p1919_p7), %s996_s20, 2 }
  0xa3   : > { %1388 = vmatpush3.bf16.msra.mxu0 %v1522_v3  ;;  %1396 = vmatpush3.bf16.msra.mxu1 %v1523_v4  ;;  %v2005_v31 = vsub.s32 %v419_v26, %v421_v27  ;;  %s998_s10 = scalar_lea.vmem (%p1919_p7), %s2156_s4, %s1369_s21 }
  0xa4   : > { %1401 = vmatprep.subr.bf16.mxu0 %v1722_v0  ;;  %v2007_v38 = vsub.s32 %v451_v30, %v421_v27 }
  0xa6   : > { %1390 = vmatmul.mubr.msk.bf16.vlgmr.msra.gmra.mrb[0].mxu0 %vm360_vm1, %v343_v5  ;;  %1398 = vmatmul.mubr.msk.bf16.vlgmr.msra.gmra.mrb[0].mxu1 %vm360_vm1, %v343_v5 }
  0xa7   : > { %1402 = vmatpush3.bf16.msra.mxu0 %v1524_v6  ;;  %1405 = vmatprep.mubr.msk.bf16.mxu0 %vm1723_vm0, %v1722_v0 }
  0xa8   : > { %1403 = vmatprep.subr.bf16.mxu0 %v1722_v0 }
  0xab   : > { %1404 = vmatpush3.bf16.msra.mxu0 %v1525_v7 }
  0xae   : > { %1406 = vmatmul.mubr.msk.bf16.vlgmr.msra.gmra.mrb[4].mxu0 %vm360_vm1, %v343_v5 }
 0x179   : > { %v398_v8 = vpop.f32.mrb[0].mxu0  ;;  %v610_v9 = vpop.f32.mrb[0].mxu1 }
 0x17a   : > { %v1391_v10 = vpop.f32.mrb[1].mxu0  ;;  %v404_v11 = vmul.f32 0.35355338, %v398_v8  ;;  %620 = vrot.lane.b32.xlu0 %v610_v9, %s1724_s30  ;;  %617 = vrot.lane.b32.xlu1 %v610_v9, %s1725_s7  ;;  %v1399_v12 = vpop.f32.mrb[1].mxu1 }
 0x17b   : > { %v401_v13 = vpop.f32.mrb[2].mxu0  ;;  %v613_v14 = vpop.f32.mrb[2].mxu1 }
 0x17c   : > { %v1392_v15 = vpop.f32.mrb[3].mxu0  ;;  %v1400_v16 = vpop.f32.mrb[3].mxu1 }
 0x17e   : > { %623 = vrot.lane.b32.xlu1 %v610_v9, %s1726_s8  ;;  %406 = vrot.lane.b32.xlu0 %v404_v11, %s1725_s7 }
 0x181   : > { %v2000_v17 = vpop.f32.mrb[4].mxu0 }
 0x182   : > { %v1407_v18 = vpop.f32.mrb[5].mxu0  ;;  %412 = vrot.lane.b32.xlu1 %v404_v11, %s1726_s8  ;;  %409 = vrot.lane.b32.xlu0 %v404_v11, %s1724_s30 }
 0x183   : > { %v823_v19 = vpop.f32.mrb[6].mxu0 }
 0x184   : > { %v1408_v20 = vpop.f32.mrb[7].mxu0 }
 0x186   : > { %830 = vrot.lane.b32.xlu1 %v2000_v17, %s1724_s30  ;;  %827 = vrot.lane.b32.xlu0 %v2000_v17, %s1725_s7 }
 0x18a   : > { %833 = vrot.lane.b32.xlu0 %v2000_v17, %s1726_s8 }
 0x1ec   : > { %v621_v28 = vpop.permute.xlu0 %620  ;;  %v618_v29 = vpop.permute.xlu1 %617 }
 0x1ed   : > { %v626_v32 = vcombine.low %v610_v9, %v621_v28  ;;  %v627_v33 = vcombine.high %v610_v9, %v621_v28 }
 0x1ef   : > { %v634_v39 = vrot.slane %v626_v32, %v2005_v31  ;;  %v641_v40 = vrot.slane %v627_v33, %v2005_v31 }
 0x1f0   : > { %v624_v34 = vpop.permute.xlu1 %623  ;;  %v407_v35 = vpop.permute.xlu0 %406 }
 0x1f1   : > { %v642_v36 = vcombine.low %v618_v29, %v624_v34  ;;  %v643_v37 = vcombine.high %v618_v29, %v624_v34 }
 0x1f3   : > { %v650_v41 = vrot.slane %v642_v36, %v2005_v31  ;;  %v657_v42 = vrot.slane %v643_v37, %v2005_v31 }
 0x1f4   : > { %v413_v43 = vpop.permute.xlu1 %412  ;;  %v410_v44 = vpop.permute.xlu0 %409 }
 0x1f5   : > { %v658_v45 = vcombine.low %v634_v39, %v650_v41  ;;  %v659_v46 = vcombine.high %v634_v39, %v650_v41  ;;  %v674_v47 = vcombine.low %v641_v40, %v657_v42  ;;  %v675_v48 = vcombine.high %v641_v40, %v657_v42 }
 0x1f6   : > { %v431_v49 = vcombine.low %v407_v35, %v413_v43  ;;  %v432_v50 = vcombine.high %v407_v35, %v413_v43  ;;  %v415_v51 = vcombine.low %v404_v11, %v410_v44  ;;  %v416_v52 = vcombine.high %v404_v11, %v410_v44 }
 0x1f7   : > { %v666_v53 = vrot.slane %v658_v45, %v2007_v38  ;;  %v673_v54 = vrot.slane %v659_v46, %v2007_v38  ;;  %v682_v55 = vrot.slane %v674_v47, %v2007_v38  ;;  %v689_v56 = vrot.slane %v675_v48, %v2007_v38 }
 0x1f8   : > { %v439_v57 = vrot.slane %v431_v49, %v2005_v31  ;;  %v446_v58 = vrot.slane %v432_v50, %v2005_v31  ;;  %v423_v59 = vrot.slane %v415_v51, %v2005_v31  ;;  %v430_v60 = vrot.slane %v416_v52, %v2005_v31  ;;  %v828_v13 = vpop.permute.xlu0 %827  ;;  %v831_v41 = vpop.permute.xlu1 %830 }
 0x1f9   : > { %v694_v61 = vcombine.low %v666_v53, %v673_v54  ;;  %v1358_v62 = vcombine.high %v666_v53, %v673_v54  ;;  %v710_v63 = vcombine.low %v682_v55, %v689_v56  ;;  %v1359_v0 = vcombine.high %v682_v55, %v689_v56 }
 0x1fa   : > { %v447_v1 = vcombine.low %v423_v59, %v439_v57  ;;  %v448_v2 = vcombine.high %v423_v59, %v439_v57  ;;  %v463_v3 = vcombine.low %v430_v60, %v446_v58  ;;  %v464_v4 = vcombine.high %v430_v60, %v446_v58 }
 0x1fb   : > { %v701_v5 = vrot.slane %v694_v61, %v2005_v31  ;;  %v709_v6 = vrot.slane %v1358_v62, %v2005_v31  ;;  %v717_v7 = vrot.slane %v710_v63, %v2005_v31  ;;  %v725_v8 = vrot.slane %v1359_v0, %v2005_v31 }
 0x1fc   : > { %v455_v9 = vrot.slane %v447_v1, %v2007_v38  ;;  %v462_v10 = vrot.slane %v448_v2, %v2007_v38  ;;  %v471_v11 = vrot.slane %v463_v3, %v2007_v38  ;;  %v478_v12 = vrot.slane %v464_v4, %v2007_v38  ;;  %v834_v42 = vpop.permute.xlu0 %833 }
 0x1fd   : > { %v726_v14 = vcombine.low %v701_v5, %v709_v6  ;;  %v727_v15 = vcombine.high %v701_v5, %v709_v6  ;;  %v742_v16 = vcombine.low %v717_v7, %v725_v8  ;;  %v743_v18 = vcombine.high %v717_v7, %v725_v8 }
 0x1fe   : > { %v483_v19 = vcombine.low %v455_v9, %v462_v10  ;;  %v1353_v20 = vcombine.high %v455_v9, %v462_v10  ;;  %v499_v21 = vcombine.low %v471_v11, %v478_v12  ;;  %v1354_v22 = vcombine.high %v471_v11, %v478_v12 }
 0x1ff   : > { %v734_v23 = vrot.slane %v726_v14, %v2007_v38  ;;  %v741_v24 = vrot.slane %v727_v15, %v2007_v38  ;;  %v750_v25 = vrot.slane %v742_v16, %v2007_v38  ;;  %v757_v26 = vrot.slane %v743_v18, %v2007_v38 }
 0x200   : > { %v490_v27 = vrot.slane %v483_v19, %v2005_v31  ;;  %v498_v28 = vrot.slane %v1353_v20, %v2005_v31  ;;  %v506_v29 = vrot.slane %v499_v21, %v2005_v31  ;;  %v514_v30 = vrot.slane %v1354_v22, %v2005_v31 }
 0x201   : > { %v758_v32 = vcombine.low %v734_v23, %v750_v25  ;;  %v759_v33 = vcombine.high %v734_v23, %v750_v25  ;;  %v760_v34 = vcombine.low %v741_v24, %v757_v26  ;;  %v761_v35 = vcombine.high %v741_v24, %v757_v26 }
 0x202   : > { %v515_v36 = vcombine.low %v490_v27, %v498_v28  ;;  %v516_v37 = vcombine.high %v490_v27, %v498_v28  ;;  %v531_v39 = vcombine.low %v506_v29, %v514_v30  ;;  %v532_v40 = vcombine.high %v506_v29, %v514_v30 }
 0x203   : > { %v762_v43 = vpack.c.bf16 %v758_v32, %v758_v32  ;;  %v763_v44 = vpack.c.bf16 %v759_v33, %v759_v33  ;;  %v764_v45 = vpack.c.bf16 %v760_v34, %v760_v34  ;;  %v765_v46 = vpack.c.bf16 %v761_v35, %v761_v35 }
 0x204   : > { %v523_v47 = vrot.slane %v515_v36, %v2007_v38  ;;  %v530_v48 = vrot.slane %v516_v37, %v2007_v38  ;;  %v539_v49 = vrot.slane %v531_v39, %v2007_v38  ;;  %v546_v50 = vrot.slane %v532_v40, %v2007_v38 }
 0x205   : > { %766 = vst.msk [vmem:[%s2045_s6] sm:$0xf] %vm555_vm2, %v762_v43  ;;  %767 = vst.msk [vmem:[%s2045_s6 + $0x4] sm:$0xf] %vm555_vm2, %v763_v44  ;;  %v836_v51 = vcombine.low %v2000_v17, %v831_v41  ;;  %v837_v52 = vcombine.high %v2000_v17, %v831_v41  ;;  %v852_v53 = vcombine.low %v828_v13, %v834_v42 }
 0x206   : > { %768 = vst.msk [vmem:[%s2045_s6 + $0x8] sm:$0xf] %vm555_vm2, %v764_v45  ;;  %769 = vst.msk [vmem:[%s2045_s6 + $0xc] sm:$0xf] %vm555_vm2, %v765_v46  ;;  %v853_v54 = vcombine.high %v828_v13, %v834_v42  ;;  %v547_v55 = vcombine.low %v523_v47, %v539_v49  ;;  %v548_v56 = vcombine.high %v523_v47, %v539_v49 }
 0x207   : > { %v549_v57 = vcombine.low %v530_v48, %v546_v50  ;;  %v550_v58 = vcombine.high %v530_v48, %v546_v50  ;;  %v844_v59 = vrot.slane %v836_v51, %v2005_v31  ;;  %v851_v60 = vrot.slane %v837_v52, %v2005_v31 }
 0x208   : > { %v860_v61 = vrot.slane %v852_v53, %v2005_v31  ;;  %v867_v62 = vrot.slane %v853_v54, %v2005_v31  ;;  %v551_v63 = vpack.c.bf16 %v547_v55, %v547_v55  ;;  %v552_v0 = vpack.c.bf16 %v548_v56, %v548_v56 }
 0x209   : > { %v553_v1 = vpack.c.bf16 %v549_v57, %v549_v57  ;;  %v554_v2 = vpack.c.bf16 %v550_v58, %v550_v58 }
 0x20a   : > { %v868_v17 = vcombine.low %v844_v59, %v860_v61  ;;  %v869_v3 = vcombine.high %v844_v59, %v860_v61  ;;  %v884_v4 = vcombine.low %v851_v60, %v867_v62  ;;  %v885_v5 = vcombine.high %v851_v60, %v867_v62  ;;  %556 = vst.msk [vmem:[%s2062_s15] sm:$0xf] %vm555_vm2, %v551_v63 }
 0x20b   : > { %557 = vst.msk [vmem:[%s2062_s15 + $0x4] sm:$0xf] %vm555_vm2, %v552_v0  ;;  %558 = vst.msk [vmem:[%s2062_s15 + $0x8] sm:$0xf] %vm555_vm2, %v553_v1 }
 0x20c   : > { %559 = vst.msk [vmem:[%s2062_s15 + $0xc] sm:$0xf] %vm555_vm2, %v554_v2  ;;  %v876_v6 = vrot.slane %v868_v17, %v2007_v38  ;;  %v883_v7 = vrot.slane %v869_v3, %v2007_v38  ;;  %v892_v8 = vrot.slane %v884_v4, %v2007_v38  ;;  %v899_v9 = vrot.slane %v885_v5, %v2007_v38 }
 0x20e   : > { %v904_v10 = vcombine.low %v876_v6, %v883_v7  ;;  %v1363_v11 = vcombine.high %v876_v6, %v883_v7  ;;  %v920_v12 = vcombine.low %v892_v8, %v899_v9  ;;  %v1364_v13 = vcombine.high %v892_v8, %v899_v9 }
 0x210   : > { %v911_v14 = vrot.slane %v904_v10, %v2005_v31  ;;  %v919_v15 = vrot.slane %v1363_v11, %v2005_v31  ;;  %v927_v16 = vrot.slane %v920_v12, %v2005_v31  ;;  %v935_v18 = vrot.slane %v1364_v13, %v2005_v31 }
 0x212   : > { %v936_v19 = vcombine.low %v911_v14, %v919_v15  ;;  %v937_v20 = vcombine.high %v911_v14, %v919_v15  ;;  %v952_v21 = vcombine.low %v927_v16, %v935_v18  ;;  %v953_v22 = vcombine.high %v927_v16, %v935_v18  ;;  %v1016_v35 = vld [vmem:[%s2062_s15 + $0x4] sm:$0xf] (%p1919_p7)  ;;  %v1018_v36 = vld [vmem:[%s2062_s15 + $0x8] sm:$0xf] (%p1919_p7) }
 0x213   : > { %v1020_v37 = vld [vmem:[%s2062_s15 + $0xc] sm:$0xf] (%p1919_p7)  ;;  %1017 = vst [vmem:[%s998_s10 + $0x8] sm:$0xf] (%p1919_p7), %v1016_v35  ;;  %1019 = vst [vmem:[%s998_s10 + $0x10] sm:$0xf] (%p1919_p7), %v1018_v36 }
 0x214   : > { %v944_v23 = vrot.slane %v936_v19, %v2007_v38  ;;  %v951_v24 = vrot.slane %v937_v20, %v2007_v38  ;;  %v960_v25 = vrot.slane %v952_v21, %v2007_v38  ;;  %v967_v26 = vrot.slane %v953_v22, %v2007_v38  ;;  %v1014_v38 = vld [vmem:[%s2062_s15] sm:$0xf] (%p1919_p7)  ;;  %1021 = vst [vmem:[%s998_s10 + $0x18] sm:$0xf] (%p1919_p7), %v1020_v37 }
 0x215   : > { %994 = sbr.rel (!%p1919_p7) target bundleno = 540 (0x21c), region = 56  ;;  %1015 = vst [vmem:[%s998_s10] sm:$0xf] (%p1919_p7), %v1014_v38 }
 0x216   : > { %v968_v27 = vcombine.low %v944_v23, %v960_v25  ;;  %v969_v28 = vcombine.high %v944_v23, %v960_v25  ;;  %v970_v29 = vcombine.low %v951_v24, %v967_v26  ;;  %v971_v30 = vcombine.high %v951_v24, %v967_v26 }
 0x218   : > { %v972_v32 = vpack.c.bf16 %v968_v27, %v968_v27  ;;  %v973_v33 = vpack.c.bf16 %v969_v28, %v969_v28  ;;  %v974_v31 = vpack.c.bf16 %v970_v29, %v970_v29  ;;  %v975_v34 = vpack.c.bf16 %v971_v30, %v971_v30 }
 0x21a   : > { %976 = vst.msk [vmem:[%s2085_s17] sm:$0xf] %vm555_vm2, %v972_v32  ;;  %977 = vst.msk [vmem:[%s2085_s17 + $0x4] sm:$0xf] %vm555_vm2, %v973_v33 }
 0x21b   : > { %978 = vst.msk [vmem:[%s2085_s17 + $0x8] sm:$0xf] %vm555_vm2, %v974_v31  ;;  %979 = vst.msk [vmem:[%s2085_s17 + $0xc] sm:$0xf] %vm555_vm2, %v975_v34 }
 0x21c PF: > { %1052 = sbr.rel (!%p1919_p7) target bundleno = 547 (0x223), region = 97  ;;  %s1370_s13 = sshll.u32 (%p1919_p7), %s1702_s25, 3  ;;  %v1072_v39 = vld [vmem:[%s2045_s6] sm:$0xf] (%p1919_p7)  ;;  %v1074_v40 = vld [vmem:[%s2045_s6 + $0x4] sm:$0xf] (%p1919_p7) }
 0x21d   : > { %s1054_s1 = sadd.s32 (%p1919_p7), %s1698_s24, %s1370_s13  ;;  %v1076_v41 = vld [vmem:[%s2045_s6 + $0x8] sm:$0xf] (%p1919_p7)  ;;  %v1078_v42 = vld [vmem:[%s2045_s6 + $0xc] sm:$0xf] (%p1919_p7) }
 0x21e   : > { %s1371_s18 = sshll.u32 (%p1919_p7), %s1054_s1, 2 }
 0x21f   : > { %s1056_s30 = scalar_lea.vmem (%p1919_p7), %s2157_s5, %s1371_s18 }
 0x220   : > { %1073 = vst [vmem:[%s1056_s30] sm:$0xf] (%p1919_p7), %v1072_v39  ;;  %1075 = vst [vmem:[%s1056_s30 + $0x8] sm:$0xf] (%p1919_p7), %v1074_v40 }
 0x221   : > { %1077 = vst [vmem:[%s1056_s30 + $0x10] sm:$0xf] (%p1919_p7), %v1076_v41  ;;  %1079 = vst [vmem:[%s1056_s30 + $0x18] sm:$0xf] (%p1919_p7), %v1078_v42 }
 0x223 PF: > { %1110 = sbr.rel (!%p1919_p7) target bundleno = 557 (0x22d), region = 138  ;;  %s1372_s7 = sshll.u32 (%p1919_p7), %s1702_s25, 3  ;;  %v1130_v43 = vld [vmem:[%s2085_s17] sm:$0xf] (%p1919_p7)  ;;  %v1132_v44 = vld [vmem:[%s2085_s17 + $0x4] sm:$0xf] (%p1919_p7) }
 0x224   : > { %s1112_s8 = sadd.s32 (%p1919_p7), %s1698_s24, %s1372_s7  ;;  %v1134_v45 = vld [vmem:[%s2085_s17 + $0x8] sm:$0xf] (%p1919_p7)  ;;  %v1136_v46 = vld [vmem:[%s2085_s17 + $0xc] sm:$0xf] (%p1919_p7)  ;;  %s2185_s14 = sld [smem:[#allocation19_spill]] (%p1919_p7) }
 0x225   : > { %s1373_s11 = sshll.u32 (%p1919_p7), %s1112_s8, 2 }
 0x22a   : > { %s1114_s20 = scalar_lea.vmem %s2185_s14, %s1373_s11 }
 0x22b   : > { %1131 = vst [vmem:[%s1114_s20] sm:$0xf] %v1130_v43  ;;  %1133 = vst [vmem:[%s1114_s20 + $0x8] sm:$0xf] %v1132_v44 }
 0x22c   : > { %1135 = vst [vmem:[%s1114_s20 + $0x10] sm:$0xf] %v1134_v45  ;;  %1137 = vst [vmem:[%s1114_s20 + $0x18] sm:$0xf] %v1136_v46 }
 0x22d PF: > { %s22_s28 = sadd.s32 1, %s1714_s28   ;;  %s2186_s12 = sld [smem:[#allocation15_spill]] }
 0x22e   : > { %p19_p7 = scmp.ge.s32.totalorder %s22_s28, 6   ;;  %s2187_s21 = smov %s1690_s22 }
 0x22f   : > { %s2188_s22 = smov %s1694_s23  ;;  %s2189_s23 = smov %s1936_s19 }
 0x230   : > { %s2190_s24 = smov %s1706_s26  ;;  %s2191_s25 = smov %s1710_s27 }
 0x231   : > { %s2193_s27 = smov %s2199_s29  ;;  %21 = sbr.rel (!%p19_p7) target bundleno = 12 (0xc), region = 235 }
 0x233   : > { %s2192_s26 = smov %s2186_s12 }
 0x238   :  { %1192 = vsyncpa [#allocation3], 1 }
 0x239   :  { %1194 = vsyncpa [#allocation3 + $0x1], 1 }
 0x23a   :  { %1195 = vsyncpa [#allocation5], 1 }
 0x23b   :  { %1196 = vsyncpa [#allocation8], 1 }

</bundles_post_ra>
